<compile_context>
chip_gen: v6e
topology: v6e:2x2x1
jax: 0.10.0
libtpu: 0.0.40
codegen_flags: <defaults>
</compile_context>

<pallas_src>
import jax
import jax.numpy as jnp
from jax.experimental import pallas as pl
from jax.experimental.pallas import tpu as pltpu

IN_F = 6       # input features
H1 = 128
H2 = 64
OUT_F = 3      # true output features
OUT_PAD = 8    # narrow padded output (block last dim == full array dim)

_PRECISION = jax.lax.Precision.HIGHEST


def mlp_kernel(x_ref, w1_ref, b1_ref, w2_ref, b2_ref, w3_ref, b3_ref, o_ref):
    # fc1 + ReLU:  (TB, 6) @ (6, 128)
    h1 = jnp.dot(x_ref[...], w1_ref[...],
                 preferred_element_type=jnp.float32, precision=_PRECISION)
    h1 = jnp.maximum(h1 + b1_ref[...], 0.0)
    # fc2 + ReLU:  (TB, 128) @ (128, 64)
    h2 = jnp.dot(h1, w2_ref[...],
                 preferred_element_type=jnp.float32, precision=_PRECISION)
    h2 = jnp.maximum(h2 + b2_ref[...], 0.0)
    # fc3 (no activation), narrow padded output:  (TB, 64) @ (64, 8)
    out = jnp.dot(h2, w3_ref[...],
                  preferred_element_type=jnp.float32, precision=_PRECISION)
    o_ref[...] = (out + b3_ref[...]).astype(o_ref.dtype)


def init_params(key):
    """Deterministic init matching nn.Linear(6,128)/(128,64)/(64,3).

    Weights are stored as (in_features, out_features) so the kernel computes
    y = x @ W + b (PyTorch stores (out, in))."""
    ks = jax.random.split(key, 6)

    def linear(kw, kb, fan_in, fan_out):
        # PyTorch default: U(-1/sqrt(fan_in), 1/sqrt(fan_in))
        bound = 1.0 / jnp.sqrt(float(fan_in))
        w = jax.random.uniform(kw, (fan_in, fan_out), jnp.float32, -bound, bound)
        b = jax.random.uniform(kb, (1, fan_out), jnp.float32, -bound, bound)
        return w, b

    w1, b1 = linear(ks[0], ks[1], IN_F, H1)
    w2, b2 = linear(ks[2], ks[3], H1, H2)
    w3, b3 = linear(ks[4], ks[5], H2, OUT_F)
    return (w1, b1, w2, b2, w3, b3)


def prepare_params(params):
    """Zero-pad fc3 once at init time for the kernel's layout:
      W3: (64, 3) -> (64, 8)   (extra output columns are exactly zero)
      b3: (1, 3)  -> (1, 8)
    so slicing [:, :3] of the kernel output recovers fc3 exactly."""
    w1, b1, w2, b2, w3, b3 = params
    w3_p = jnp.pad(w3, ((0, 0), (0, OUT_PAD - OUT_F)))
    b3_p = jnp.pad(b3, ((0, 0), (0, OUT_PAD - OUT_F)))
    return (w1, b1, w2, b2, w3_p, b3_p)


def _round_up(n, m):
    return ((n + m - 1) // m) * m


def net_forward(x, padded_params, *, max_tile=2048):
    """x: (B, 6) f32.  padded_params from prepare_params().  Returns (B, 3)."""
    w1, b1, w2, b2, w3, b3 = padded_params
    B = x.shape[0]

    # Batch tile: multiple of 8 sublanes, capped at max_tile, and sized so
    # large batches give at least ~8 grid steps (keeps the "parallel" batch
    # axis useful on v7x's 2 TensorCores; per-step overhead ~0.35 us is noise).
    TB = max(8, min(max_tile, _round_up(pl.cdiv(B, 8), 8)))
    grid = (pl.cdiv(B, TB),)  # ragged last block is masked by Pallas

    out = pl.pallas_call(
        mlp_kernel,
        out_shape=jax.ShapeDtypeStruct((B, OUT_PAD), jnp.float32),
        grid=grid,
        in_specs=[
            # streamed input tile: (TB, 6) — no wrapper-side padding of x
            pl.BlockSpec((TB, IN_F), lambda i: (i, 0)),
            # weights / biases: constant block index -> resident in VMEM
            pl.BlockSpec((IN_F, H1), lambda i: (0, 0)),
            pl.BlockSpec((1, H1), lambda i: (0, 0)),
            pl.BlockSpec((H1, H2), lambda i: (0, 0)),
            pl.BlockSpec((1, H2), lambda i: (0, 0)),
            pl.BlockSpec((H2, OUT_PAD), lambda i: (0, 0)),
            pl.BlockSpec((1, OUT_PAD), lambda i: (0, 0)),
        ],
        # narrow (TB, 8) output block -> minimal HBM writeback
        out_specs=pl.BlockSpec((TB, OUT_PAD), lambda i: (i, 0)),
        compiler_params=pltpu.CompilerParams(
            dimension_semantics=("parallel",),
        ),
    )(x, w1, b1, w2, b2, w3, b3)

    return out[:, :OUT_F]


def reference_forward(x, params):
    w1, b1, w2, b2, w3, b3 = params
    h1 = jnp.maximum(jnp.dot(x, w1, precision=_PRECISION) + b1, 0.0)
    h2 = jnp.maximum(jnp.dot(h1, w2, precision=_PRECISION) + b2, 0.0)
    return jnp.dot(h2, w3, precision=_PRECISION) + b3


if __name__ == "__main__":
    key = jax.random.PRNGKey(0)
    kx, kp = jax.random.split(key)

    params = init_params(kp)
    padded_params = prepare_params(params)

    # small smoke test
    B = 8
    x = jax.random.normal(kx, (B, IN_F), dtype=jnp.float32)
    out = jax.block_until_ready(net_forward(x, padded_params))
    ref = reference_forward(x, params)
    assert out.shape == (B, OUT_F), out.shape
    assert jnp.allclose(out, ref, atol=1e-5, rtol=1e-5), "mismatch vs JAX reference"

    # non-tile-multiple, multi-step batch exercises the ragged-grid path
    B2 = 1037
    x2 = jax.random.normal(kx, (B2, IN_F), dtype=jnp.float32)
    out2 = jax.block_until_ready(net_forward(x2, padded_params))
    ref2 = reference_forward(x2, params)
    assert out2.shape == (B2, OUT_F), out2.shape
    assert jnp.allclose(out2, ref2, atol=1e-5, rtol=1e-5), "mismatch (tiled) vs JAX reference"

    print("KERNEL_OK")
</pallas_src>

<mosaic_0001>
module attributes {stable_mosaic.version = 11 : i64} {
  func.func @mlp_kernel(%arg0: i32, %arg1: memref<8x6xf32, #tpu.memory_space<vmem>>, %arg2: memref<6x128xf32, #tpu.memory_space<vmem>>, %arg3: memref<1x128xf32, #tpu.memory_space<vmem>>, %arg4: memref<128x64xf32, #tpu.memory_space<vmem>>, %arg5: memref<1x64xf32, #tpu.memory_space<vmem>>, %arg6: memref<64x8xf32, #tpu.memory_space<vmem>>, %arg7: memref<1x8xf32, #tpu.memory_space<vmem>>, %arg8: memref<8x8xf32, #tpu.memory_space<vmem>>) attributes {dimension_semantics = [#tpu.dimension_semantics<parallel>], iteration_bounds = array<i64: 1>, scalar_prefetch = 0 : i64, scratch_operands = 0 : i64, tpu.core_type = #tpu.core_type<tc>, window_params = [{transform_indices = @transform_0, window_bounds = array<i64: 8, 6>}, {pipeline_mode = #tpu.pipeline_mode<synchronous>, transform_indices = @transform_1, window_bounds = array<i64: 6, 128>}, {pipeline_mode = #tpu.pipeline_mode<synchronous>, transform_indices = @transform_2, window_bounds = array<i64: 1, 128>}, {pipeline_mode = #tpu.pipeline_mode<synchronous>, transform_indices = @transform_3, window_bounds = array<i64: 128, 64>}, {pipeline_mode = #tpu.pipeline_mode<synchronous>, transform_indices = @transform_4, window_bounds = array<i64: 1, 64>}, {pipeline_mode = #tpu.pipeline_mode<synchronous>, transform_indices = @transform_5, window_bounds = array<i64: 64, 8>}, {pipeline_mode = #tpu.pipeline_mode<synchronous>, transform_indices = @transform_6, window_bounds = array<i64: 1, 8>}, {transform_indices = @transform_7, window_bounds = array<i64: 8, 8>}]} {
    %c0 = arith.constant 0 : index
    %c0_0 = arith.constant 0 : index
    %0 = vector.load %arg1[%c0, %c0_0] : memref<8x6xf32, #tpu.memory_space<vmem>>, vector<8x6xf32>
    %c0_1 = arith.constant 0 : index
    %c0_2 = arith.constant 0 : index
    %1 = vector.load %arg2[%c0_1, %c0_2] : memref<6x128xf32, #tpu.memory_space<vmem>>, vector<6x128xf32>
    %cst = arith.constant dense<0.000000e+00> : vector<8x128xf32>
    %2 = tpu.matmul %0, %1, %cst {dimension_numbers = #tpu.dot_dimension_numbers<[1], [0], [0], [1], [0, 0, 1, 1], [], []>, precision = #tpu.contract_precision<fp32>} : vector<8x6xf32>, vector<6x128xf32>, vector<8x128xf32> -> vector<8x128xf32>
    %c0_3 = arith.constant 0 : index
    %c0_4 = arith.constant 0 : index
    %3 = vector.load %arg3[%c0_3, %c0_4] : memref<1x128xf32, #tpu.memory_space<vmem>>, vector<1x128xf32>
    %4 = vector.broadcast %3 : vector<1x128xf32> to vector<8x128xf32>
    %5 = arith.addf %2, %4 : vector<8x128xf32>
    %cst_5 = arith.constant 0.000000e+00 : f32
    %6 = vector.broadcast %cst_5 : f32 to vector<8x128xf32>
    %7 = arith.maximumf %5, %6 : vector<8x128xf32>
    %c0_6 = arith.constant 0 : index
    %c0_7 = arith.constant 0 : index
    %8 = vector.load %arg4[%c0_6, %c0_7] : memref<128x64xf32, #tpu.memory_space<vmem>>, vector<128x64xf32>
    %cst_8 = arith.constant dense<0.000000e+00> : vector<8x64xf32>
    %9 = tpu.matmul %7, %8, %cst_8 {dimension_numbers = #tpu.dot_dimension_numbers<[1], [0], [0], [1], [0, 0, 1, 1], [], []>, precision = #tpu.contract_precision<fp32>} : vector<8x128xf32>, vector<128x64xf32>, vector<8x64xf32> -> vector<8x64xf32>
    %c0_9 = arith.constant 0 : index
    %c0_10 = arith.constant 0 : index
    %10 = vector.load %arg5[%c0_9, %c0_10] : memref<1x64xf32, #tpu.memory_space<vmem>>, vector<1x64xf32>
    %11 = vector.broadcast %10 : vector<1x64xf32> to vector<8x64xf32>
    %12 = arith.addf %9, %11 : vector<8x64xf32>
    %cst_11 = arith.constant 0.000000e+00 : f32
    %13 = vector.broadcast %cst_11 : f32 to vector<8x64xf32>
    %14 = arith.maximumf %12, %13 : vector<8x64xf32>
    %c0_12 = arith.constant 0 : index
    %c0_13 = arith.constant 0 : index
    %15 = vector.load %arg6[%c0_12, %c0_13] : memref<64x8xf32, #tpu.memory_space<vmem>>, vector<64x8xf32>
    %cst_14 = arith.constant dense<0.000000e+00> : vector<8x8xf32>
    %16 = tpu.matmul %14, %15, %cst_14 {dimension_numbers = #tpu.dot_dimension_numbers<[1], [0], [0], [1], [0, 0, 1, 1], [], []>, precision = #tpu.contract_precision<fp32>} : vector<8x64xf32>, vector<64x8xf32>, vector<8x8xf32> -> vector<8x8xf32>
    %c0_15 = arith.constant 0 : index
    %c0_16 = arith.constant 0 : index
    %17 = vector.load %arg7[%c0_15, %c0_16] : memref<1x8xf32, #tpu.memory_space<vmem>>, vector<1x8xf32>
    %18 = vector.broadcast %17 : vector<1x8xf32> to vector<8x8xf32>
    %19 = arith.addf %16, %18 : vector<8x8xf32>
    %c0_17 = arith.constant 0 : index
    %c0_18 = arith.constant 0 : index
    %20 = vector.load %arg8[%c0_17, %c0_18] : memref<8x8xf32, #tpu.memory_space<vmem>>, vector<8x8xf32>
    tpu.vector_store %arg8[%c0_17, %c0_18], %19 {strides = array<i32>} : memref<8x8xf32, #tpu.memory_space<vmem>>, vector<8x8xf32>,
    return
  }
  func.func @transform_0(%arg0: i32) -> (i32, i32) {
    %c0_i32 = arith.constant 0 : i32
    %c0_i32_0 = arith.constant 0 : i32
    return %arg0, %c0_i32 : i32, i32
  }
  func.func @transform_1(%arg0: i32) -> (i32, i32) {
    %c0_i32 = arith.constant 0 : i32
    %c0_i32_0 = arith.constant 0 : i32
    %c0_i32_1 = arith.constant 0 : i32
    return %c0_i32, %c0_i32_0 : i32, i32
  }
  func.func @transform_2(%arg0: i32) -> (i32, i32) {
    %c0_i32 = arith.constant 0 : i32
    %c0_i32_0 = arith.constant 0 : i32
    %c0_i32_1 = arith.constant 0 : i32
    return %c0_i32, %c0_i32_0 : i32, i32
  }
  func.func @transform_3(%arg0: i32) -> (i32, i32) {
    %c0_i32 = arith.constant 0 : i32
    %c0_i32_0 = arith.constant 0 : i32
    %c0_i32_1 = arith.constant 0 : i32
    return %c0_i32, %c0_i32_0 : i32, i32
  }
  func.func @transform_4(%arg0: i32) -> (i32, i32) {
    %c0_i32 = arith.constant 0 : i32
    %c0_i32_0 = arith.constant 0 : i32
    %c0_i32_1 = arith.constant 0 : i32
    return %c0_i32, %c0_i32_0 : i32, i32
  }
  func.func @transform_5(%arg0: i32) -> (i32, i32) {
    %c0_i32 = arith.constant 0 : i32
    %c0_i32_0 = arith.constant 0 : i32
    %c0_i32_1 = arith.constant 0 : i32
    return %c0_i32, %c0_i32_0 : i32, i32
  }
  func.func @transform_6(%arg0: i32) -> (i32, i32) {
    %c0_i32 = arith.constant 0 : i32
    %c0_i32_0 = arith.constant 0 : i32
    %c0_i32_1 = arith.constant 0 : i32
    return %c0_i32, %c0_i32_0 : i32, i32
  }
  func.func @transform_7(%arg0: i32) -> (i32, i32) {
    %c0_i32 = arith.constant 0 : i32
    %c0_i32_0 = arith.constant 0 : i32
    return %arg0, %c0_i32 : i32, i32
  }
}

</mosaic_0001>

<bundles_post_ra>
// kernel: tpu_custom_call.1
= control target key start
LH: loop header
LB: loop body
LE: loop exit
PB: predicated region body
PF: predicated region fallthrough
CT: control target
= control target key end

     0   :  { %vm40_vm0 = vcmask 1045504   ;;  %v2278_v2 = vmov 0.0   ;;  %vm2279_vm1 = vmmov 0   ;;  %vm36_vm2 = vcmask 48128   ;;  %s2974_s0 = inlined_call_operand.vmem [shape: f32[8,6], index: 0, kind: input, shape index: {}]   ;;  %s2975_s1 = inlined_call_operand.vmem [shape: f32[6,128], index: 1, kind: input, shape index: {}]   ;;  %s2976_s2 = inlined_call_operand.vmem [shape: f32[1,128], index: 2, kind: input, shape index: {}]   ;;  %s2977_s3 = inlined_call_operand.vmem [shape: f32[128,64], index: 3, kind: input, shape index: {}]   ;;  %s2978_s4 = inlined_call_operand.vmem [shape: f32[1,64], index: 4, kind: input, shape index: {}]   ;;  %s2979_s5 = inlined_call_operand.vmem [shape: f32[64,8], index: 5, kind: input, shape index: {}]   ;;  %s2980_s6 = inlined_call_operand.vmem [shape: f32[1,8], index: 6, kind: input, shape index: {}]   ;;  %s2981_s7 = inlined_call_operand.hbm [shape: f32[8,8], index: 7, kind: output, shape index: {}]  }
   0x1   :  { %v28_v0 = vld [vmem:[%s2975_s1] sm:$0x3f]  ;;  %1899 = vmatprep.subr.mxu0 %v2278_v2  ;;  %1901 = vmatprep.mubr.msk.f32.mxu0 %vm2279_vm1, %v2278_v2  ;;  %v506_v4 = vld [vmem:[%s2977_s3 + $0x78] sm:$0xff]  ;;  %v505_v5 = vld [vmem:[%s2977_s3 + $0x70] sm:$0xff] }
   0x2   :  { %v27_v1 = vld [vmem:[%s2974_s0] sm:$0xff]  ;;  %v42_v3 = vsel %vm40_vm0, %v28_v0, 0  ;;  %1904 = vmatprep.subr.mxu1 %v2278_v2  ;;  %1906 = vmatprep.mubr.msk.f32.mxu1 %vm2279_vm1, %v2278_v2  ;;  %v2339_v8 = vand.u32 4294901760, %v506_v4  ;;  %v504_v10 = vld [vmem:[%s2977_s3 + $0x68] sm:$0xff]  ;;  %v2344_v12 = vand.u32 4294901760, %v505_v5 }
   0x3   :  { %v75_v6 = vand.u32 4294901760, %v42_v3  ;;  %v38_v7 = vsel %vm36_vm2, %v27_v1, 0 }
   0x4   :  { %v110_v9 = vand.u32 4294901760, %v38_v7 }
   0x5   :  { %1900 = vmatpush3.msra.mxu0 %v75_v6  ;;  %v152_v11 = vsub.f32 %v42_v3, %v75_v6 }
   0x6   :  { %12 = vsyncpa [#allocation3], 0  ;;  %1909 = vmatprep.subr.mxu0 %v2278_v2  ;;  %v111_v13 = vsub.f32 %v38_v7, %v110_v9  ;;  %v503_v14 = vld [vmem:[%s2977_s3 + $0x60] sm:$0xff]  ;;  %v2351_v16 = vsub.f32 %v506_v4, %v2339_v8  ;;  %v2353_v17 = vand.u32 4294901760, %v504_v10  ;;  %v502_v19 = vld [vmem:[%s2977_s3 + $0x58] sm:$0xff]  ;;  %v2359_v21 = vsub.f32 %v505_v5, %v2344_v12  ;;  %s2280_s28 = smov [#allocation2]  }
   0x7   :  { %v153_v15 = vand.u32 4294901760, %v152_v11  ;;  %v2361_v22 = vand.u32 4294901760, %v503_v14  ;;  %v501_v24 = vld [vmem:[%s2977_s3 + $0x50] sm:$0xff]  ;;  %v2370_v28 = vand.u32 4294901760, %v502_v19  ;;  %v500_v30 = vld [vmem:[%s2977_s3 + $0x48] sm:$0xff]  ;;  %v499_v34 = vld [vmem:[%s2977_s3 + $0x40] sm:$0xff] }
   0x8   :  { %v112_v18 = vand.u32 4294901760, %v111_v13  ;;  %v608_v26 = vand.u32 4294901760, %v2351_v16  ;;  %v2368_v27 = vsub.f32 %v504_v10, %v2353_v17  ;;  %v615_v31 = vand.u32 4294901760, %v2359_v21  ;;  %v498_v63 = vld [vmem:[%s2977_s3 + $0x38] sm:$0xff]  ;;  %v497_v1 = vld [vmem:[%s2977_s3 + $0x30] sm:$0xff]  ;;  %v496_v5 = vld [vmem:[%s2977_s3 + $0x28] sm:$0xff] }
   0x9   :  { %v154_v20 = vsub.f32 %v152_v11, %v153_v15  ;;  %v2377_v32 = vsub.f32 %v503_v14, %v2361_v22  ;;  %v2379_v33 = vand.u32 4294901760, %v501_v24  ;;  %v2390_v37 = vsub.f32 %v502_v19, %v2370_v28  ;;  %v495_v10 = vld [vmem:[%s2977_s3 + $0x20] sm:$0xff]  ;;  %s1720_s29 = sshll.u32 %s2280_s28, 4  ;;  %s1721_s29 = int_to_ptr.vmem [resolvable:$true] %s1720_s29 }
   0xa   :  { %v113_v23 = vsub.f32 %v111_v13, %v112_v18  ;;  %v609_v35 = vsub.f32 %v2351_v16, %v608_v26  ;;  %v622_v36 = vand.u32 4294901760, %v2368_v27  ;;  %v2392_v38 = vand.u32 4294901760, %v500_v30  ;;  %s2256_s30 = scalar_lea.vmem %s1721_s29, 128  ;;  %p2261_p1 = scmp.lt.s32.totalorder %s1721_s29, %s1721_s29 }
   0xb   :  { %v155_v25 = vand.u32 4294901760, %v154_v20  ;;  %v616_v39 = vsub.f32 %v2359_v21, %v615_v31  ;;  %v629_v40 = vand.u32 4294901760, %v2377_v32  ;;  %v2404_v41 = vsub.f32 %v501_v24, %v2379_v33  ;;  %p2257_p0 = scmp.ne.s32.totalorder %s1721_s29, %s2256_s30  ;;  %p2262_p2 = scmp.lt.s32.totalorder %s2256_s30, %s2256_s30 }
   0xc   :  { %v114_v29 = vand.u32 4294901760, %v113_v23  ;;  %v2406_v42 = vand.u32 4294901760, %v499_v34  ;;  %v610_v43 = vand.u32 4294901760, %v609_v35  ;;  %v623_v44 = vsub.f32 %v2368_v27, %v622_v36 }
   0xd   :  { %1905 = vmatpush3.msra.mxu1 %v155_v25  ;;  %v636_v45 = vand.u32 4294901760, %v2390_v37  ;;  %v2414_v46 = vsub.f32 %v500_v30, %v2392_v38  ;;  %v617_v47 = vand.u32 4294901760, %v616_v39  ;;  %v630_v48 = vsub.f32 %v2377_v32, %v629_v40  ;;  %p2263_p3 = por %p2262_p2, %p2261_p1 }
   0xe   :  { %1902 = vmatmul.mubr.f32.vlgmr.msra.gmra.mxu0 %v114_v29  ;;  %1907 = vmatmul.mubr.f32.vlgmr.msra.gmra.mxu1 %v110_v9  ;;  %v643_v49 = vand.u32 4294901760, %v2404_v41  ;;  %v2426_v50 = vsub.f32 %v499_v34, %v2406_v42  ;;  %v624_v51 = vand.u32 4294901760, %v623_v44  ;;  %v2474_v0 = vand.u32 4294901760, %v498_v63  ;;  %v493_v29 = vld [vmem:[%s2977_s3 + $0x10] sm:$0xff]  ;;  %v492_v44 = vld [vmem:[%s2977_s3 + $0x8] sm:$0xff] }
   0xf   :  { %1910 = vmatpush3.msra.mxu0 %v152_v11  ;;  %1914 = vmatprep.subr.mxu1 %v2278_v2  ;;  %v637_v52 = vsub.f32 %v2390_v37, %v636_v45  ;;  %v650_v53 = vand.u32 4294901760, %v2414_v46  ;;  %v631_v54 = vand.u32 4294901760, %v630_v48  ;;  %v2482_v4 = vand.u32 4294901760, %v497_v1  ;;  %p2264_p4 = pnand %p2263_p3, %p2257_p0 }
  0x10   :  { %1915 = vmatpush3.msra.mxu1 %v75_v6  ;;  %1911 = vmatprep.mubr.msk.f32.mxu0 %vm2279_vm1, %v2278_v2  ;;  %v644_v55 = vsub.f32 %v2404_v41, %v643_v49  ;;  %v657_v56 = vand.u32 4294901760, %v2426_v50  ;;  %v2480_v3 = vsub.f32 %v498_v63, %v2474_v0  ;;  %v2532_v39 = vand.u32 4294901760, %v493_v29 }
  0x11   :  { %1919 = vmatprep.subr.mxu0 %v2278_v2  ;;  %1916 = vmatprep.mubr.msk.f32.mxu1 %vm2279_vm1, %v2278_v2  ;;  %v638_v57 = vand.u32 4294901760, %v637_v52  ;;  %v651_v58 = vsub.f32 %v2414_v46, %v650_v53  ;;  %v2491_v7 = vsub.f32 %v497_v1, %v2482_v4  ;;  %v2548_v52 = vand.u32 4294901760, %v492_v44 }
  0x12   :  { %1912 = vmatmul.mubr.f32.vlgmr.msra.gmra.mxu0 %v111_v13  ;;  %1917 = vmatmul.mubr.f32.vlgmr.msra.gmra.mxu1 %v112_v18  ;;  %v645_v59 = vand.u32 4294901760, %v644_v55  ;;  %v658_v60 = vsub.f32 %v2426_v50, %v657_v56  ;;  %v494_v18 = vld [vmem:[%s2977_s3 + $0x18] sm:$0xff]  ;;  %v491_v55 = vld [vmem:[%s2977_s3] sm:$0xff]  ;;  %vm1171_vm3 = vcmask 523264   ;;  %vm1712_vm4 = vcmask 64512  }
  0x13   :  { %1920 = vmatpush3.msra.mxu0 %v153_v15  ;;  %1924 = vmatprep.subr.mxu1 %v2278_v2  ;;  %v652_v61 = vand.u32 4294901760, %v651_v58  ;;  %v671_v13 = vand.u32 4294901760, %v2491_v7  ;;  %v2507_v15 = vand.u32 4294901760, %v495_v10  ;;  %v2522_v25 = vand.u32 4294901760, %v494_v18 }
  0x14   :  { %1925 = vmatpush3.msra.mxu1 %v75_v6  ;;  %1921 = vmatprep.mubr.msk.f32.mxu0 %vm2279_vm1, %v2278_v2  ;;  %v659_v62 = vand.u32 4294901760, %v658_v60  ;;  %v664_v6 = vand.u32 4294901760, %v2480_v3  ;;  %v2561_v60 = vand.u32 4294901760, %v491_v55 }
  0x15   :  { %1926 = vmatprep.mubr.msk.f32.mxu1 %vm2279_vm1, %v2278_v2  ;;  %1964 = vmatprep.subr.mxu1 %v2278_v2  ;;  %v672_v20 = vsub.f32 %v2491_v7, %v671_v13  ;;  %v2519_v24 = vsub.f32 %v495_v10, %v2507_v15 }
  0x16   :  { %1922 = vmatmul.mubr.f32.vlgmr.msra.gmra.mxu0 %v110_v9  ;;  %1927 = vmatmul.mubr.f32.vlgmr.msra.gmra.mxu1 %v110_v9  ;;  %v2493_v9 = vand.u32 4294901760, %v496_v5  ;;  %v665_v11 = vsub.f32 %v2480_v3, %v664_v6  ;;  %v2574_v1 = vsub.f32 %v491_v55, %v2561_v60 }
  0x17   :  { %1965 = vmatpush3.msra.mxu1 %v610_v43  ;;  %1929 = vmatprep.subr.mxu0 %v2278_v2  ;;  %v673_v30 = vand.u32 4294901760, %v672_v20  ;;  %v2986_v35 = vand.u32 4294901760, %v2519_v24  ;;  %v2536_v43 = vsub.f32 %v494_v18, %v2522_v25 }
  0x18   :  { %1966 = vmatprep.subr.mxu1 %v2278_v2  ;;  %1930 = vmatpush3.msra.mxu0 %v2339_v8  ;;  %v2505_v14 = vsub.f32 %v496_v5, %v2493_v9  ;;  %v666_v19 = vand.u32 4294901760, %v665_v11  ;;  %v2982_v18 = vand.u32 4294901760, %v2574_v1 }
  0x19   :  { %1967 = vmatpush3.msra.mxu1 %v617_v47  ;;  %1931 = vmatprep.subr.mxu0 %v2278_v2  ;;  %v686_v48 = vsub.f32 %v2519_v24, %v2986_v35 }
  0x1a   :  { %1968 = vmatprep.subr.mxu1 %v2278_v2  ;;  %1932 = vmatpush3.msra.mxu0 %v2344_v12  ;;  %v2987_v23 = vand.u32 4294901760, %v2505_v14  ;;  %v714_v20 = vsub.f32 %v2574_v1, %v2982_v18 }
  0x1b   :  { %1969 = vmatpush3.msra.mxu1 %v624_v51  ;;  %1933 = vmatprep.subr.mxu0 %v2278_v2  ;;  %v2546_v51 = vsub.f32 %v493_v29, %v2532_v39 }
  0x1c   :  { %1970 = vmatprep.subr.mxu1 %v2278_v2  ;;  %1934 = vmatpush3.msra.mxu0 %v2353_v17  ;;  %v679_v34 = vsub.f32 %v2505_v14, %v2987_v23  ;;  %v715_v29 = vand.u32 4294901760, %v714_v20 }
  0x1d   :  { %1971 = vmatpush3.msra.mxu1 %v631_v54  ;;  %1935 = vmatprep.subr.mxu0 %v2278_v2  ;;  %v2985_v54 = vand.u32 4294901760, %v2536_v43  ;;  %v2984_v58 = vand.u32 4294901760, %v2546_v51 }
  0x1e   :  { %1972 = vmatprep.subr.mxu1 %v2278_v2  ;;  %1936 = vmatpush3.msra.mxu0 %v2361_v22  ;;  %v680_v47 = vand.u32 4294901760, %v679_v34 }
  0x1f   :  { %1973 = vmatpush3.msra.mxu1 %v638_v57  ;;  %1937 = vmatprep.subr.mxu0 %v2278_v2  ;;  %v687_v57 = vand.u32 4294901760, %v686_v48 }
  0x20   :  { %1974 = vmatprep.subr.mxu1 %v2278_v2  ;;  %1938 = vmatpush3.msra.mxu0 %v2370_v28 }
  0x21   :  { %1975 = vmatpush3.msra.mxu1 %v645_v59  ;;  %1939 = vmatprep.subr.mxu0 %v2278_v2  ;;  %v2559_v59 = vsub.f32 %v492_v44, %v2548_v52 }
  0x22   :  { %1976 = vmatprep.subr.mxu1 %v2278_v2  ;;  %1940 = vmatpush3.msra.mxu0 %v2379_v33 }
  0x23   :  { %1977 = vmatpush3.msra.mxu1 %v652_v61  ;;  %1941 = vmatprep.subr.mxu0 %v2278_v2  ;;  %v693_v61 = vsub.f32 %v2536_v43, %v2985_v54  ;;  %v2983_v63 = vand.u32 4294901760, %v2559_v59 }
  0x24   :  { %1978 = vmatprep.subr.mxu1 %v2278_v2  ;;  %1942 = vmatpush3.msra.mxu0 %v2392_v38 }
  0x25   :  { %1979 = vmatpush3.msra.mxu1 %v659_v62  ;;  %1943 = vmatprep.subr.mxu0 %v2278_v2  ;;  %v700_v62 = vsub.f32 %v2546_v51, %v2984_v58  ;;  %v694_v5 = vand.u32 4294901760, %v693_v61  ;;  %v707_v11 = vsub.f32 %v2559_v59, %v2983_v63 }
  0x26   :  { %1980 = vmatprep.subr.mxu1 %v2278_v2  ;;  %1944 = vmatpush3.msra.mxu0 %v2406_v42 }
  0x27   :  { %1945 = vmatprep.subr.mxu0 %v2278_v2  ;;  %1996 = vmatprep.mubr.msk.f32.mxu1 %vm2279_vm1, %v2278_v2  ;;  %v701_v10 = vand.u32 4294901760, %v700_v62 }
  0x28   :  { %1961 = vmatprep.mubr.msk.f32.mxu0 %vm2279_vm1, %v2278_v2  ;;  %1946 = vmatpush3.msra.mxu0 %v2474_v0 }
  0x29   :  { %1947 = vmatprep.subr.mxu0 %v2278_v2  ;;  %1981 = vmatpush3.msra.mxu1 %v666_v19  ;;  %v708_v19 = vand.u32 4294901760, %v707_v11 }
  0x2a   :  { %1948 = vmatpush3.msra.mxu0 %v2482_v4  ;;  %1982 = vmatprep.subr.mxu1 %v2278_v2 }
  0x2b   :  { %1949 = vmatprep.subr.mxu0 %v2278_v2  ;;  %1983 = vmatpush3.msra.mxu1 %v673_v30  ;;  %v1728_v30 = vld [vmem:[%s2976_s2] ss:$0 sm:$0xff] }
  0x2c   :  { %1950 = vmatpush3.msra.mxu0 %v2493_v9  ;;  %1984 = vmatprep.subr.mxu1 %v2278_v2 }
  0x2d   :  { %1951 = vmatprep.subr.mxu0 %v2278_v2  ;;  %1985 = vmatpush3.msra.mxu1 %v680_v47 }
  0x2e   :  { %1952 = vmatpush3.msra.mxu0 %v2507_v15  ;;  %1986 = vmatprep.subr.mxu1 %v2278_v2 }
  0x2f   :  { %1953 = vmatprep.subr.mxu0 %v2278_v2  ;;  %1987 = vmatpush3.msra.mxu1 %v687_v57 }
  0x30   :  { %1954 = vmatpush3.msra.mxu0 %v2522_v25  ;;  %1988 = vmatprep.subr.mxu1 %v2278_v2 }
  0x31   :  { %1955 = vmatprep.subr.mxu0 %v2278_v2  ;;  %1989 = vmatpush3.msra.mxu1 %v694_v5 }
  0x32   :  { %1956 = vmatpush3.msra.mxu0 %v2532_v39  ;;  %1990 = vmatprep.subr.mxu1 %v2278_v2 }
  0x33   :  { %1957 = vmatprep.subr.mxu0 %v2278_v2  ;;  %1991 = vmatpush3.msra.mxu1 %v701_v10 }
  0x34   :  { %1958 = vmatpush3.msra.mxu0 %v2548_v52  ;;  %1992 = vmatprep.subr.mxu1 %v2278_v2 }
  0x35   :  { %1959 = vmatprep.subr.mxu0 %v2278_v2  ;;  %1993 = vmatpush3.msra.mxu1 %v708_v19 }
  0x36   :  { %1960 = vmatpush3.msra.mxu0 %v2561_v60  ;;  %1994 = vmatprep.subr.mxu1 %v2278_v2 }
  0x37   :  { %1999 = vmatprep.subr.mxu0 %v2278_v2  ;;  %1995 = vmatpush3.msra.mxu1 %v715_v29 }
  0x38   :  { %2034 = vmatprep.subr.mxu1 %v2278_v2 }
  0xce   :  { %v116_v34 = vpop.f32.mrf.mxu0  ;;  %v192_v44 = vpop.f32.mrf.mxu1 }
  0xcf   :  { %v117_v47 = vadd.f32 %v1728_v30, %v116_v34 }
  0xd0   :  { %v1903_v48 = vpop.f32.mrf.mxu0  ;;  %v1908_v55 = vpop.f32.mrf.mxu1 }
  0xd1   :  { %v193_v57 = vadd.f32 %v192_v44, %v117_v47 }
  0xd2   :  { %v266_v61 = vpop.f32.mrf.mxu0  ;;  %v340_v62 = vpop.f32.mrf.mxu1 }
  0xd3   :  { %v267_v5 = vadd.f32 %v266_v61, %v193_v57 }
  0xd4   :  { %v1913_v10 = vpop.f32.mrf.mxu0  ;;  %v1918_v11 = vpop.f32.mrf.mxu1 }
  0xd5   :  { %v341_v19 = vadd.f32 %v340_v62, %v267_v5 }
  0xd6   :  { %v414_v20 = vpop.f32.mrf.mxu0  ;;  %v486_v29 = vpop.f32.mrf.mxu1 }
  0xd7   :  { %v415_v18 = vadd.f32 %v414_v20, %v341_v19 }
  0xd8   :  { %v1923_v63 = vpop.f32.mrf.mxu0  ;;  %v1928_v58 = vpop.f32.mrf.mxu1 }
  0xd9   :  { %v487_v54 = vadd.f32 %v486_v29, %v415_v18 }
  0xdb   :  { %v490_v35 = vmax.f32 %v487_v54, 0.0 }
  0xdd   :  { %v2594_v23 = vand.u32 4294901760, %v490_v35 }
  0xdf   :  { %v2597_v30 = vsub.f32 %v490_v35, %v2594_v23  ;;  %1997 = vmatmul.mubr.f32.vlgmr.msra.gmra.mxu1 %v2594_v23 }
  0xe0   :  { %2035 = vmatpush3.msra.mxu1 %v2339_v8  ;;  %2066 = vmatprep.mubr.msk.f32.mxu1 %vm2279_vm1, %v2278_v2 }
  0xe1   :  { %v597_v34 = vand.u32 4294901760, %v2597_v30  ;;  %2036 = vmatprep.subr.mxu1 %v2278_v2 }
  0xe2   :  { %2037 = vmatpush3.msra.mxu1 %v2344_v12 }
  0xe3   :  { %v598_v54 = vsub.f32 %v2597_v30, %v597_v34  ;;  %2038 = vmatprep.subr.mxu1 %v2278_v2 }
  0xe4   :  { %2039 = vmatpush3.msra.mxu1 %v2353_v17 }
  0xe5   :  { %2040 = vmatprep.subr.mxu1 %v2278_v2  ;;  %v599_v35 = vand.u32 4294901760, %v598_v54 }
  0xe6   :  { %2041 = vmatpush3.msra.mxu1 %v2361_v22 }
  0xe7   :  { %2042 = vmatprep.subr.mxu1 %v2278_v2  ;;  %1962 = vmatmul.mubr.f32.vlgmr.msra.gmra.mxu0 %v599_v35  ;;  %v1729_v35 = vld [vmem:[%s2978_s4] ss:$0 sm:$0xff] }
  0xe8   :  { %2000 = vmatpush3.msra.mxu0 %v2351_v16  ;;  %2043 = vmatpush3.msra.mxu1 %v2370_v28  ;;  %v2990_v16 = vand.u32 4294901760, %v2536_v43 }
  0xe9   :  { %2001 = vmatprep.subr.mxu0 %v2278_v2  ;;  %2044 = vmatprep.subr.mxu1 %v2278_v2 }
  0xea   :  { %2002 = vmatpush3.msra.mxu0 %v2359_v21  ;;  %2045 = vmatpush3.msra.mxu1 %v2379_v33  ;;  %v2992_v21 = vand.u32 4294901760, %v2559_v59 }
  0xeb   :  { %2003 = vmatprep.subr.mxu0 %v2278_v2  ;;  %2046 = vmatprep.subr.mxu1 %v2278_v2 }
  0xec   :  { %2004 = vmatpush3.msra.mxu0 %v2368_v27  ;;  %2047 = vmatpush3.msra.mxu1 %v2392_v38 }
  0xed   :  { %2005 = vmatprep.subr.mxu0 %v2278_v2  ;;  %2048 = vmatprep.subr.mxu1 %v2278_v2 }
  0xee   :  { %2006 = vmatpush3.msra.mxu0 %v2377_v32  ;;  %2049 = vmatpush3.msra.mxu1 %v2406_v42 }
  0xef   :  { %2007 = vmatprep.subr.mxu0 %v2278_v2  ;;  %2050 = vmatprep.subr.mxu1 %v2278_v2 }
  0xf0   :  { %2008 = vmatpush3.msra.mxu0 %v2390_v37  ;;  %2051 = vmatpush3.msra.mxu1 %v2474_v0 }
  0xf1   :  { %2009 = vmatprep.subr.mxu0 %v2278_v2  ;;  %2052 = vmatprep.subr.mxu1 %v2278_v2 }
  0xf2   :  { %2010 = vmatpush3.msra.mxu0 %v2404_v41  ;;  %2053 = vmatpush3.msra.mxu1 %v2482_v4 }
  0xf3   :  { %2011 = vmatprep.subr.mxu0 %v2278_v2  ;;  %2054 = vmatprep.subr.mxu1 %v2278_v2 }
  0xf4   :  { %2012 = vmatpush3.msra.mxu0 %v2414_v46  ;;  %2055 = vmatpush3.msra.mxu1 %v2493_v9 }
  0xf5   :  { %2013 = vmatprep.subr.mxu0 %v2278_v2  ;;  %2056 = vmatprep.subr.mxu1 %v2278_v2 }
  0xf6   :  { %2014 = vmatpush3.msra.mxu0 %v2426_v50  ;;  %2057 = vmatpush3.msra.mxu1 %v2507_v15 }
  0xf7   :  { %2015 = vmatprep.subr.mxu0 %v2278_v2  ;;  %2058 = vmatprep.subr.mxu1 %v2278_v2 }
  0xf8   :  { %2016 = vmatpush3.msra.mxu0 %v2480_v3  ;;  %2059 = vmatpush3.msra.mxu1 %v2522_v25 }
  0xf9   :  { %2017 = vmatprep.subr.mxu0 %v2278_v2  ;;  %2060 = vmatprep.subr.mxu1 %v2278_v2 }
  0xfa   :  { %2018 = vmatpush3.msra.mxu0 %v2491_v7  ;;  %2061 = vmatpush3.msra.mxu1 %v2532_v39 }
  0xfb   :  { %2019 = vmatprep.subr.mxu0 %v2278_v2  ;;  %2062 = vmatprep.subr.mxu1 %v2278_v2 }
  0xfc   :  { %2020 = vmatpush3.msra.mxu0 %v2505_v14  ;;  %2063 = vmatpush3.msra.mxu1 %v2548_v52 }
  0xfd   :  { %2021 = vmatprep.subr.mxu0 %v2278_v2  ;;  %2064 = vmatprep.subr.mxu1 %v2278_v2 }
  0xfe   :  { %2022 = vmatpush3.msra.mxu0 %v2519_v24  ;;  %2065 = vmatpush3.msra.mxu1 %v2561_v60 }
  0xff   :  { %2023 = vmatprep.subr.mxu0 %v2278_v2  ;;  %2067 = vmatmul.mubr.f32.vlgmr.msra.gmra.mxu1 %v597_v34 }
 0x100   :  { %2104 = vmatprep.subr.mxu1 %v2278_v2  ;;  %2024 = vmatpush3.msra.mxu0 %v2536_v43 }
 0x101   :  { %2105 = vmatpush3.msra.mxu1 %v2339_v8  ;;  %2025 = vmatprep.subr.mxu0 %v2278_v2  ;;  %v2988_v8 = vand.u32 4294901760, %v2505_v14 }
 0x102   :  { %2106 = vmatprep.subr.mxu1 %v2278_v2  ;;  %2026 = vmatpush3.msra.mxu0 %v2546_v51 }
 0x103   :  { %2107 = vmatpush3.msra.mxu1 %v2344_v12  ;;  %2027 = vmatprep.subr.mxu0 %v2278_v2  ;;  %v2989_v12 = vand.u32 4294901760, %v2519_v24 }
 0x104   :  { %2108 = vmatprep.subr.mxu1 %v2278_v2  ;;  %2028 = vmatpush3.msra.mxu0 %v2559_v59 }
 0x105   :  { %2109 = vmatpush3.msra.mxu1 %v2353_v17  ;;  %2029 = vmatprep.subr.mxu0 %v2278_v2  ;;  %v2991_v17 = vand.u32 4294901760, %v2546_v51  ;;  %v1156_v51 = vld [vmem:[%s2979_s5] sm:$0xff] }
 0x106   :  { %2110 = vmatprep.subr.mxu1 %v2278_v2  ;;  %2030 = vmatpush3.msra.mxu0 %v2574_v1 }
 0x107   :  { %2031 = vmatprep.mubr.msk.f32.mxu0 %vm2279_vm1, %v2278_v2  ;;  %2111 = vmatpush3.msra.mxu1 %v2361_v22  ;;  %v2993_v22 = vand.u32 4294901760, %v2574_v1 }
 0x108   :  { %2032 = vmatmul.mubr.f32.vlgmr.msra.gmra.mxu0 %v2597_v30  ;;  %2069 = vmatprep.subr.mxu0 %v2278_v2 }
 0x109   :  { %2112 = vmatprep.subr.mxu1 %v2278_v2  ;;  %2070 = vmatpush3.msra.mxu0 %v608_v26  ;;  %v1163_v26 = vld [vmem:[%s2979_s5 + $0x38] sm:$0xff] }
 0x10a   :  { %2113 = vmatpush3.msra.mxu1 %v2370_v28  ;;  %2071 = vmatprep.subr.mxu0 %v2278_v2  ;;  %v2764_v27 = vand.u32 4294901760, %v1163_v26  ;;  %v1162_v28 = vld [vmem:[%s2979_s5 + $0x30] sm:$0xff] }
 0x10b   :  { %2114 = vmatprep.subr.mxu1 %v2278_v2  ;;  %2072 = vmatpush3.msra.mxu0 %v615_v31  ;;  %v2772_v32 = vand.u32 4294901760, %v1162_v28 }
 0x10c   :  { %2115 = vmatpush3.msra.mxu1 %v2379_v33  ;;  %2073 = vmatprep.subr.mxu0 %v2278_v2  ;;  %v2770_v31 = vsub.f32 %v1163_v26, %v2764_v27  ;;  %v1161_v33 = vld [vmem:[%s2979_s5 + $0x28] sm:$0xff] }
 0x10d   :  { %2116 = vmatprep.subr.mxu1 %v2278_v2  ;;  %2074 = vmatpush3.msra.mxu0 %v622_v36  ;;  %v2781_v37 = vsub.f32 %v1162_v28, %v2772_v32 }
 0x10e   :  { %2117 = vmatpush3.msra.mxu1 %v2392_v38  ;;  %2075 = vmatprep.subr.mxu0 %v2278_v2  ;;  %v1277_v36 = vand.u32 4294901760, %v2770_v31  ;;  %v2783_v38 = vand.u32 4294901760, %v1161_v33 }
 0x10f   :  { %2118 = vmatprep.subr.mxu1 %v2278_v2  ;;  %2076 = vmatpush3.msra.mxu0 %v629_v40  ;;  %v1160_v40 = vld [vmem:[%s2979_s5 + $0x20] sm:$0xff] }
 0x110   :  { %2119 = vmatpush3.msra.mxu1 %v2406_v42  ;;  %2077 = vmatprep.subr.mxu0 %v2278_v2  ;;  %v1278_v41 = vsub.f32 %v2770_v31, %v1277_v36  ;;  %v1284_v42 = vand.u32 4294901760, %v2781_v37  ;;  %v2797_v46 = vand.u32 4294901760, %v1160_v40 }
 0x111   :  { %2120 = vmatprep.subr.mxu1 %v2278_v2  ;;  %2078 = vmatpush3.msra.mxu0 %v636_v45  ;;  %v2795_v45 = vsub.f32 %v1161_v33, %v2783_v38 }
 0x112   :  { %2121 = vmatpush3.msra.mxu1 %v2474_v0  ;;  %2079 = vmatprep.subr.mxu0 %v2278_v2  ;;  %v1279_v50 = vand.u32 4294901760, %v1278_v41  ;;  %v2809_v0 = vsub.f32 %v1160_v40, %v2797_v46 }
 0x113   :  { %2122 = vmatprep.subr.mxu1 %v2278_v2  ;;  %2080 = vmatpush3.msra.mxu0 %v643_v49  ;;  %v1159_v49 = vld [vmem:[%s2979_s5 + $0x18] sm:$0xff] }
 0x114   :  { %2123 = vmatpush3.msra.mxu1 %v2482_v4  ;;  %2081 = vmatprep.subr.mxu0 %v2278_v2  ;;  %v2812_v3 = vand.u32 4294901760, %v1159_v49  ;;  %v1158_v4 = vld [vmem:[%s2979_s5 + $0x10] sm:$0xff] }
 0x115   :  { %2124 = vmatprep.subr.mxu1 %v2278_v2  ;;  %2082 = vmatpush3.msra.mxu0 %v650_v53  ;;  %v1285_v53 = vsub.f32 %v2781_v37, %v1284_v42 }
 0x116   :  { %2125 = vmatpush3.msra.mxu1 %v2493_v9  ;;  %2083 = vmatprep.subr.mxu0 %v2278_v2  ;;  %v1298_v9 = vand.u32 4294901760, %v2809_v0  ;;  %v2826_v14 = vsub.f32 %v1159_v49, %v2812_v3 }
 0x117   :  { %2126 = vmatprep.subr.mxu1 %v2278_v2  ;;  %2084 = vmatpush3.msra.mxu0 %v657_v56  ;;  %v1291_v56 = vand.u32 4294901760, %v2795_v45 }
 0x118   :  { %2127 = vmatpush3.msra.mxu1 %v2507_v15  ;;  %2085 = vmatprep.subr.mxu0 %v2278_v2  ;;  %v1157_v15 = vld [vmem:[%s2979_s5 + $0x8] sm:$0xff]  ;;  %v1299_v24 = vsub.f32 %v2809_v0, %v1298_v9  ;;  %v1305_v43 = vand.u32 4294901760, %v2826_v14 }
 0x119   :  { %2128 = vmatprep.subr.mxu1 %v2278_v2  ;;  %2086 = vmatpush3.msra.mxu0 %v664_v6  ;;  %v1286_v6 = vand.u32 4294901760, %v1285_v53  ;;  %v1292_v7 = vsub.f32 %v2795_v45, %v1291_v56 }
 0x11a   :  { %2129 = vmatpush3.msra.mxu1 %v2522_v25  ;;  %2087 = vmatprep.subr.mxu0 %v2278_v2  ;;  %v1306_v63 = vsub.f32 %v2826_v14, %v1305_v43 }
 0x11b   :  { %2130 = vmatprep.subr.mxu1 %v2278_v2  ;;  %2088 = vmatpush3.msra.mxu0 %v671_v13  ;;  %v2822_v13 = vand.u32 4294901760, %v1158_v4 }
 0x11c   :  { %2131 = vmatpush3.msra.mxu1 %v2532_v39  ;;  %2089 = vmatprep.subr.mxu0 %v2278_v2  ;;  %v2838_v39 = vand.u32 4294901760, %v1157_v15  ;;  %v1307_v47 = vand.u32 4294901760, %v1306_v63 }
 0x11d   :  { %2132 = vmatprep.subr.mxu1 %v2278_v2  ;;  %2090 = vmatpush3.msra.mxu0 %v2988_v8  ;;  %v2836_v25 = vsub.f32 %v1158_v4, %v2822_v13 }
 0x11e   :  { %2133 = vmatpush3.msra.mxu1 %v2548_v52  ;;  %2091 = vmatprep.subr.mxu0 %v2278_v2  ;;  %v1300_v52 = vand.u32 4294901760, %v1299_v24  ;;  %v2849_v59 = vsub.f32 %v1157_v15, %v2838_v39 }
 0x11f   :  { %2134 = vmatprep.subr.mxu1 %v2278_v2  ;;  %2092 = vmatpush3.msra.mxu0 %v2989_v12  ;;  %v1312_v58 = vand.u32 4294901760, %v2836_v25 }
 0x120   :  { %2135 = vmatpush3.msra.mxu1 %v2561_v60  ;;  %2136 = vmatprep.mubr.msk.f32.mxu1 %vm2279_vm1, %v2278_v2  ;;  %v2851_v60 = vand.u32 4294901760, %v1156_v51  ;;  %v1319_v18 = vand.u32 4294901760, %v2849_v59 }
 0x121   :  { %2093 = vmatprep.subr.mxu0 %v2278_v2  ;;  %2137 = vmatmul.mubr.f32.vlgmr.msra.gmra.mxu1 %v2594_v23  ;;  %v1313_v1 = vsub.f32 %v2836_v25, %v1312_v58 }
 0x122   :  { %2094 = vmatpush3.msra.mxu0 %v2990_v16  ;;  %2101 = vmatprep.mubr.msk.f32.mxu0 %vm2279_vm1, %v2278_v2  ;;  %v2864_v44 = vsub.f32 %v1156_v51, %v2851_v60  ;;  %v1320_v55 = vsub.f32 %v2849_v59, %v1319_v18 }
 0x123   :  { %2095 = vmatprep.subr.mxu0 %v2278_v2  ;;  %2158 = vmatprep.subr.mxu1 %v2278_v2  ;;  %v1314_v48 = vand.u32 4294901760, %v1313_v1 }
 0x124   :  { %2096 = vmatpush3.msra.mxu0 %v2991_v17  ;;  %2174 = vmatprep.mubr.msk.f32.mxu1 %vm2279_vm1, %v2278_v2  ;;  %v1326_v57 = vand.u32 4294901760, %v2864_v44  ;;  %v1321_v61 = vand.u32 4294901760, %v1320_v55 }
 0x125   :  { %2097 = vmatprep.subr.mxu0 %v2278_v2  ;;  %2159 = vmatpush3.msra.mxu1 %v1279_v50 }
 0x126   :  { %2098 = vmatpush3.msra.mxu0 %v2992_v21  ;;  %2160 = vmatprep.subr.mxu1 %v2278_v2  ;;  %v1327_v62 = vsub.f32 %v2864_v44, %v1326_v57 }
 0x127   :  { %2099 = vmatprep.subr.mxu0 %v2278_v2  ;;  %2161 = vmatpush3.msra.mxu1 %v1286_v6 }
 0x128   :  { %2100 = vmatpush3.msra.mxu0 %v2993_v22  ;;  %2162 = vmatprep.subr.mxu1 %v2278_v2  ;;  %v1328_v5 = vand.u32 4294901760, %v1327_v62 }
 0x129   :  { %2102 = vmatmul.mubr.f32.vlgmr.msra.gmra.mxu0 %v2594_v23  ;;  %2139 = vmatprep.subr.mxu0 %v2278_v2  ;;  %v1293_v23 = vand.u32 4294901760, %v1292_v7 }
 0x12a   :  { %2155 = vmatprep.mubr.msk.f32.mxu0 %vm2279_vm1, %v2278_v2  ;;  %2140 = vmatpush3.msra.mxu0 %v2764_v27 }
 0x12b   :  { %2141 = vmatprep.subr.mxu0 %v2278_v2  ;;  %2163 = vmatpush3.msra.mxu1 %v1293_v23 }
 0x12c   :  { %2142 = vmatpush3.msra.mxu0 %v2772_v32  ;;  %2164 = vmatprep.subr.mxu1 %v2278_v2 }
 0x12d   :  { %2143 = vmatprep.subr.mxu0 %v2278_v2  ;;  %2165 = vmatpush3.msra.mxu1 %v1300_v52 }
 0x12e   :  { %2144 = vmatpush3.msra.mxu0 %v2783_v38  ;;  %2166 = vmatprep.subr.mxu1 %v2278_v2 }
 0x12f   :  { %2145 = vmatprep.subr.mxu0 %v2278_v2  ;;  %2167 = vmatpush3.msra.mxu1 %v1307_v47 }
 0x130   :  { %2146 = vmatpush3.msra.mxu0 %v2797_v46  ;;  %2168 = vmatprep.subr.mxu1 %v2278_v2 }
 0x131   :  { %2147 = vmatprep.subr.mxu0 %v2278_v2  ;;  %2169 = vmatpush3.msra.mxu1 %v1314_v48 }
 0x132   :  { %2148 = vmatpush3.msra.mxu0 %v2812_v3  ;;  %2170 = vmatprep.subr.mxu1 %v2278_v2 }
 0x133   :  { %2149 = vmatprep.subr.mxu0 %v2278_v2  ;;  %2171 = vmatpush3.msra.mxu1 %v1321_v61 }
 0x134   :  { %2150 = vmatpush3.msra.mxu0 %v2822_v13  ;;  %2172 = vmatprep.subr.mxu1 %v2278_v2 }
 0x135   :  { %2151 = vmatprep.subr.mxu0 %v2278_v2  ;;  %2173 = vmatpush3.msra.mxu1 %v1328_v5 }
 0x136   :  { %2152 = vmatpush3.msra.mxu0 %v2838_v39  ;;  %2196 = vmatprep.subr.mxu1 %v2278_v2 }
 0x137   :  { %2153 = vmatprep.subr.mxu0 %v2278_v2 }
 0x138   :  { %2154 = vmatpush3.msra.mxu0 %v2851_v60 }
 0x139   :  { %2177 = vmatprep.subr.mxu0 %v2278_v2 }
 0x19f   :  { %v752_v10 = vpop.f32.mrf.mxu1 }
 0x1a1   :  { %v1998_v11 = vpop.f32.mrf.mxu1 }
 0x1a7   :  { %v601_v19 = vpop.f32.mrf.mxu0 }
 0x1a8   :  { %v602_v8 = vadd.f32 %v1729_v35, %v601_v19 }
 0x1a9   :  { %v1963_v20 = vpop.f32.mrf.mxu0 }
 0x1aa   :  { %v753_v16 = vadd.f32 %v752_v10, %v602_v8 }
 0x1bf   :  { %v945_v29 = vpop.f32.mrf.mxu1 }
 0x1c1   :  { %v2068_v30 = vpop.f32.mrf.mxu1 }
 0x1c8   :  { %v856_v34 = vpop.f32.mrf.mxu0 }
 0x1c9   :  { %v857_v21 = vadd.f32 %v856_v34, %v753_v16 }
 0x1ca   :  { %v2033_v54 = vpop.f32.mrf.mxu0 }
 0x1cb   :  { %v946_v22 = vadd.f32 %v945_v29, %v857_v21 }
 0x1e1   :  { %v1151_v12 = vpop.f32.mrf.mxu1 }
 0x1e3   :  { %v2138_v17 = vpop.f32.mrf.mxu1 }
 0x1e9   :  { %v1064_v26 = vpop.f32.mrf.mxu0 }
 0x1ea   :  { %v1065_v28 = vadd.f32 %v1064_v26, %v946_v22 }
 0x1eb   :  { %v2103_v33 = vpop.f32.mrf.mxu0 }
 0x1ec   :  { %v1152_v40 = vadd.f32 %v1151_v12, %v1065_v28 }
 0x1ee   :  { %v1155_v41 = vmax.f32 %v1152_v40, 0.0 }
 0x1f0   :  { %v1173_v49 = vsel %vm1171_vm3, %v1155_v41, 0 }
 0x1f1   :  { %v2884_v50 = vand.u32 4294901760, %v1173_v49 }
 0x1f3   :  { %v1249_v53 = vsub.f32 %v1173_v49, %v2884_v50  ;;  %2175 = vmatmul.mubr.f32.vlgmr.msra.gmra.mxu1 %v2884_v50 }
 0x1f4   :  { %2197 = vmatpush3.msra.mxu1 %v2764_v27  ;;  %2212 = vmatprep.mubr.msk.f32.mxu1 %vm2279_vm1, %v2278_v2 }
 0x1f5   :  { %2198 = vmatprep.subr.mxu1 %v2278_v2  ;;  %v1250_v4 = vand.u32 4294901760, %v1249_v53 }
 0x1f6   :  { %2199 = vmatpush3.msra.mxu1 %v2772_v32 }
 0x1f7   :  { %2200 = vmatprep.subr.mxu1 %v2278_v2  ;;  %v1251_v6 = vsub.f32 %v1249_v53, %v1250_v4 }
 0x1f8   :  { %2201 = vmatpush3.msra.mxu1 %v2783_v38 }
 0x1f9   :  { %2202 = vmatprep.subr.mxu1 %v2278_v2  ;;  %v1252_v7 = vand.u32 4294901760, %v1251_v6 }
 0x1fa   :  { %2203 = vmatpush3.msra.mxu1 %v2797_v46 }
 0x1fb   :  { %2204 = vmatprep.subr.mxu1 %v2278_v2  ;;  %2156 = vmatmul.mubr.f32.vlgmr.msra.gmra.mxu0 %v1252_v7 }
 0x1fc   :  { %2178 = vmatpush3.msra.mxu0 %v2770_v31  ;;  %2205 = vmatpush3.msra.mxu1 %v2812_v3 }
 0x1fd   :  { %2179 = vmatprep.subr.mxu0 %v2278_v2  ;;  %2206 = vmatprep.subr.mxu1 %v2278_v2 }
 0x1fe   :  { %2180 = vmatpush3.msra.mxu0 %v2781_v37  ;;  %2207 = vmatpush3.msra.mxu1 %v2822_v13 }
 0x1ff   :  { %2181 = vmatprep.subr.mxu0 %v2278_v2  ;;  %2208 = vmatprep.subr.mxu1 %v2278_v2 }
 0x200   :  { %2182 = vmatpush3.msra.mxu0 %v2795_v45  ;;  %2209 = vmatpush3.msra.mxu1 %v2838_v39 }
 0x201   :  { %2183 = vmatprep.subr.mxu0 %v2278_v2  ;;  %2210 = vmatprep.subr.mxu1 %v2278_v2 }
 0x202   :  { %2184 = vmatpush3.msra.mxu0 %v2809_v0  ;;  %2211 = vmatpush3.msra.mxu1 %v2851_v60 }
 0x203   :  { %2185 = vmatprep.subr.mxu0 %v2278_v2  ;;  %2213 = vmatmul.mubr.f32.vlgmr.msra.gmra.mxu1 %v1250_v4 }
 0x204   :  { %2234 = vmatprep.subr.mxu1 %v2278_v2  ;;  %2186 = vmatpush3.msra.mxu0 %v2826_v14 }
 0x205   :  { %2235 = vmatpush3.msra.mxu1 %v2764_v27  ;;  %2187 = vmatprep.subr.mxu0 %v2278_v2 }
 0x206   :  { %2236 = vmatprep.subr.mxu1 %v2278_v2  ;;  %2188 = vmatpush3.msra.mxu0 %v2836_v25 }
 0x207   :  { %2237 = vmatpush3.msra.mxu1 %v2772_v32  ;;  %2189 = vmatprep.subr.mxu0 %v2278_v2 }
 0x208   :  { %2238 = vmatprep.subr.mxu1 %v2278_v2  ;;  %2190 = vmatpush3.msra.mxu0 %v2849_v59 }
 0x209   :  { %2239 = vmatpush3.msra.mxu1 %v2783_v38  ;;  %2191 = vmatprep.subr.mxu0 %v2278_v2 }
 0x20a   :  { %2240 = vmatprep.subr.mxu1 %v2278_v2  ;;  %2192 = vmatpush3.msra.mxu0 %v2864_v44 }
 0x20b   :  { %2193 = vmatprep.mubr.msk.f32.mxu0 %vm2279_vm1, %v2278_v2  ;;  %2241 = vmatpush3.msra.mxu1 %v2797_v46  ;;  %v1730_v46 = vld [vmem:[%s2980_s6] ss:$0 sm:$0xff] }
 0x20c   :  { %2194 = vmatmul.mubr.f32.vlgmr.msra.gmra.mxu0 %v1249_v53  ;;  %2215 = vmatprep.subr.mxu0 %v2278_v2 }
 0x20d   :  { %2242 = vmatprep.subr.mxu1 %v2278_v2  ;;  %2216 = vmatpush3.msra.mxu0 %v1277_v36 }
 0x20e   :  { %2243 = vmatpush3.msra.mxu1 %v2812_v3  ;;  %2217 = vmatprep.subr.mxu0 %v2278_v2 }
 0x20f   :  { %2244 = vmatprep.subr.mxu1 %v2278_v2  ;;  %2218 = vmatpush3.msra.mxu0 %v1284_v42 }
 0x210   :  { %2245 = vmatpush3.msra.mxu1 %v2822_v13  ;;  %2219 = vmatprep.subr.mxu0 %v2278_v2 }
 0x211   :  { %2246 = vmatprep.subr.mxu1 %v2278_v2  ;;  %2220 = vmatpush3.msra.mxu0 %v1291_v56 }
 0x212   :  { %2247 = vmatpush3.msra.mxu1 %v2838_v39  ;;  %2221 = vmatprep.subr.mxu0 %v2278_v2 }
 0x213   :  { %2248 = vmatprep.subr.mxu1 %v2278_v2  ;;  %2222 = vmatpush3.msra.mxu0 %v1298_v9 }
 0x214   :  { %2249 = vmatpush3.msra.mxu1 %v2851_v60  ;;  %2250 = vmatprep.mubr.msk.f32.mxu1 %vm2279_vm1, %v2278_v2 }
 0x215   :  { %2223 = vmatprep.subr.mxu0 %v2278_v2  ;;  %2251 = vmatmul.mubr.f32.vlgmr.msra.gmra.mxu1 %v2884_v50 }
 0x216   :  { %2224 = vmatpush3.msra.mxu0 %v1305_v43  ;;  %2231 = vmatprep.mubr.msk.f32.mxu0 %vm2279_vm1, %v2278_v2 }
 0x217   :  { %2225 = vmatprep.subr.mxu0 %v2278_v2 }
 0x218   :  { %2226 = vmatpush3.msra.mxu0 %v1312_v58 }
 0x219   :  { %2227 = vmatprep.subr.mxu0 %v2278_v2 }
 0x21a   :  { %2228 = vmatpush3.msra.mxu0 %v1319_v18 }
 0x21b   :  { %2229 = vmatprep.subr.mxu0 %v2278_v2 }
 0x21c   :  { %2230 = vmatpush3.msra.mxu0 %v1326_v57 }
 0x21d   :  { %2232 = vmatmul.mubr.f32.vlgmr.msra.gmra.mxu0 %v2884_v50 }
 0x2b3   :  { %v1365_v27 = vpop.f32.mrf.mxu1 }
 0x2b5   :  { %v2176_v31 = vpop.f32.mrf.mxu1 }
 0x2bb   :  { %v1254_v32 = vpop.f32.mrf.mxu0 }
 0x2bc   :  { %v1255_v56 = vadd.f32 %v1730_v46, %v1254_v32 }
 0x2bd   :  { %v2157_v36 = vpop.f32.mrf.mxu0 }
 0x2be   :  { %v1366_v2 = vadd.f32 %v1365_v27, %v1255_v56 }
 0x2c3   :  { %v1534_v37 = vpop.f32.mrf.mxu1 }
 0x2c5   :  { %v2214_v38 = vpop.f32.mrf.mxu1 }
 0x2cc   :  { %v1453_v42 = vpop.f32.mrf.mxu0 }
 0x2cd   :  { %v1454_v9 = vadd.f32 %v1453_v42, %v1366_v2 }
 0x2ce   :  { %v2195_v45 = vpop.f32.mrf.mxu0 }
 0x2cf   :  { %v1535_v13 = vadd.f32 %v1534_v37, %v1454_v9 }
 0x2d5   :  { %v1708_v0 = vpop.f32.mrf.mxu1 }
 0x2d7   :  { %v2252_v3 = vpop.f32.mrf.mxu1 }
 0x2dd   :  { %v1629_v14 = vpop.f32.mrf.mxu0 }
 0x2de   :  { %v1630_v15 = vadd.f32 %v1629_v14, %v1535_v13 }
 0x2df   :  { %v2233_v23 = vpop.f32.mrf.mxu0 }
 0x2e0   :  { %v1709_v24 = vadd.f32 %v1708_v0, %v1630_v15 }
 0x2e2   :  { %1713 = vst.msk [vmem:[#allocation2] sm:$0xff] %vm1712_vm4, %v1709_v24 }
 0x2e3   :  { %2267 = shalt.err (!%p2264_p4)
}
 0x2e4   :  { %1723 = dma.vmem_to_hbm [thread:$0]  %s1721_s29, 128, %s2981_s7, [#allocation3]  }
 0x2e5   :  { %2276 = dma.done.wait [#allocation3], 128  }
 0x2e6   :  { %2277 = vsyncadd [#allocation3], 4294967168 }
 0x2e7   :  { %1727 = vsyncpa [#allocation3], 1 }

</bundles_post_ra>
